<compile_context>
chip_gen: v6e
topology: v6e:2x2x1
jax: 0.10.0
libtpu: 0.0.40
codegen_flags: <defaults>
</compile_context>

<pallas_src>
import functools

import jax
import jax.numpy as jnp
from jax.experimental import pallas as pl
from jax.experimental.pallas import tpu as pltpu

_CHANS = (3, 8, 16, 32)   # conv1/2/3 channel chain: Cin_i = _CHANS[i], Cout_i = _CHANS[i+1]
_MARG = 128               # lane margin so the interior region starts lane-tile aligned


# -----------------------------------------------------------------------------
# Fused Pallas kernel: conv layers 0..stage for one block of Nb batch elements
# -----------------------------------------------------------------------------
def _fused_conv_soi_kernel(x_ref, mask_ref, *refs, H, W, Nb, stage):
    """refs = [w0, b0, ..., w_stage, b_stage, soi_ref, act_1, ..., act_stage]

      x_ref   : (3, L) bf16, L = 2*_MARG + Nb*S, S = (H+2)*(W+2).
                Lane _MARG + e*S + s holds element e's zero-halo-padded image
                at flat padded-spatial position s (channels on sublanes).
      mask_ref: (1, Nb*S) f32, 1.0 at interior (non-halo) padded positions.
      w_i     : (9, Cout_i, Cin_i) bf16   (tap-major 3x3 weights)
      b_i     : (Cout_i, 1) f32
      soi_ref : (1, 1, Nb) f32 output block (per-element soi)
      act_i   : (Cout_{i-1}, L) bf16 VMEM scratch holding layer i's padded input
    """
    n_layers = stage + 1
    wb = refs[:2 * n_layers]
    soi_ref = refs[2 * n_layers]
    act_refs = refs[2 * n_layers + 1:]

    Hp, Wp = H + 2, W + 2
    S = Hp * Wp
    NbS = Nb * S

    interior = mask_ref[...] > 0.5          # (1, NbS) bool, broadcast over Cout

    # Invariant (keep!): activation scratch is NEVER zero-initialised.  The
    # [_MARG, _MARG+NbS) region is fully rewritten every grid step before the
    # next layer reads it; every interior output lane only reads lanes inside
    # its own element's padded image (tap offsets are bounded by Wp+1 <= _MARG),
    # and all other lanes only feed halo outputs that the `interior` select
    # below discards — so stale margin data (even NaN) can never leak in.
    src_ref = x_ref
    for layer in range(n_layers):
        cin, cout = _CHANS[layer], _CHANS[layer + 1]
        w_ref, b_ref = wb[2 * layer], wb[2 * layer + 1]

        # 3x3 SAME conv = 9 accumulated MXU pushes from lane-shifted views.
        # Output lane t (= e*S + s) needs source lane _MARG + t + (dy-1)*Wp + (dx-1).
        acc = None
        for dy in range(3):
            for dx in range(3):
                st = _MARG - (Wp + 1) + dy * Wp + dx            # static lane offset
                tap = src_ref[:, st:st + NbS]                   # (cin, NbS) bf16
                d = jnp.dot(w_ref[3 * dy + dx], tap,            # (cout, cin) @ (cin, NbS)
                            preferred_element_type=jnp.float32)  # (cout, NbS) f32
                acc = d if acc is None else acc + d
        y = acc + b_ref[...]                                    # bias add, f32, lane-dense

        if layer == stage:
            # soi = mean over C,H,W of |conv + bias| (pre-ReLU), per batch element.
            inv = 1.0 / float(cout * H * W)
            masked_abs = jnp.where(interior, jnp.abs(y), 0.0)   # halo lanes -> 0
            parts = []
            for e in range(Nb):
                s_e = jnp.sum(masked_abs[:, e * S:(e + 1) * S]) * inv
                parts.append(jnp.broadcast_to(s_e, (1, 1, 1)))
            soi_ref[...] = parts[0] if Nb == 1 else jnp.concatenate(parts, axis=-1)
        else:
            # ReLU'd activation (halo forced to exact zero) becomes the next
            # layer's padded input; bf16 in VMEM scratch, never touches HBM.
            act = jnp.where(interior, jnp.maximum(y, 0.0), 0.0).astype(jnp.bfloat16)
            nxt = act_refs[layer]
            nxt[:, _MARG:_MARG + NbS] = act                     # lane-tile-aligned store
            src_ref = nxt


# -----------------------------------------------------------------------------
# Wrapper
# -----------------------------------------------------------------------------
def _pick_block_batch(N, S):
    # Fold Nb batch elements per grid step (grows the matmul lane dim to Nb*S)
    # while keeping the parallel grid even and >= 2 when possible so both v7x
    # TensorCores get work.
    cap = max(1, min(N, 2048 // S + 1))
    for nb in range(cap, 0, -1):
        if N % nb == 0 and (N // nb) % 2 == 0:
            return nb
    for nb in range(cap, 0, -1):
        if N % nb == 0:
            return nb
    return 1


@functools.partial(jax.jit, static_argnums=(2,))
def net_forward(x_nchw, params, stage):
    assert stage in (0, 1, 2), "PyTorch forward only defines `soi` for stage 0/1/2"
    N, C, H, W = x_nchw.shape
    assert C == _CHANS[0]
    Hp, Wp = H + 2, W + 2
    S = Hp * Wp
    Nb = _pick_block_batch(N, S)
    G = N // Nb
    NbS = Nb * S
    L = 2 * _MARG + NbS
    n_layers = stage + 1

    # Tiny layout prep on the 3-channel input (no NHWC transpose): zero-pad the
    # 1-px halo, flatten padded spatial, pack Nb elements contiguously along
    # the lane axis, add lane margins so every shifted tap slice is in-bounds.
    x = x_nchw.astype(jnp.float32)
    xp = jnp.pad(x, ((0, 0), (0, 0), (1, 1), (1, 1)))                      # (N,3,Hp,Wp)
    xp = xp.reshape(G, Nb, C, S).transpose(0, 2, 1, 3).reshape(G, C, NbS)  # (G,3,Nb*S)
    xp = jnp.pad(xp, ((0, 0), (0, 0), (_MARG, _MARG))).astype(jnp.bfloat16)  # (G,3,L)

    # Interior (non-halo) mask over the packed padded-spatial lane axis.
    row_ok = (jnp.arange(Hp) >= 1) & (jnp.arange(Hp) <= H)
    col_ok = (jnp.arange(Wp) >= 1) & (jnp.arange(Wp) <= W)
    mask = (row_ok[:, None] & col_ok[None, :]).reshape(1, S)
    mask = jnp.tile(mask, (1, Nb)).astype(jnp.float32)                     # (1, Nb*S)

    inputs = [xp, mask]
    in_specs = [
        pl.BlockSpec((None, C, L), lambda g: (g, 0, 0)),
        pl.BlockSpec((1, NbS), lambda g: (0, 0)),
    ]
    for i in range(n_layers):
        w, b = params[i]                                       # w: (3,3,Cin,Cout) HWIO
        cin, cout = _CHANS[i], _CHANS[i + 1]
        # Tap-major weights: w_taps[3*ky+kx, co, c] = w[ky, kx, c, co]
        w_taps = jnp.transpose(w, (0, 1, 3, 2)).reshape(9, cout, cin)
        inputs.append(w_taps.astype(jnp.bfloat16))
        inputs.append(b.reshape(cout, 1).astype(jnp.float32))
        in_specs.append(pl.BlockSpec((9, cout, cin), lambda g: (0, 0, 0)))
        in_specs.append(pl.BlockSpec((cout, 1), lambda g: (0, 0)))

    # One bf16 VMEM buffer per fused layer boundary (layers 1..stage inputs).
    scratch = [pltpu.VMEM((_CHANS[i + 1], L), jnp.bfloat16) for i in range(stage)]

    kernel = functools.partial(_fused_conv_soi_kernel, H=H, W=W, Nb=Nb, stage=stage)
    soi = pl.pallas_call(
        kernel,
        out_shape=jax.ShapeDtypeStruct((G, 1, Nb), jnp.float32),
        grid=(G,),
        in_specs=in_specs,
        out_specs=pl.BlockSpec((1, 1, Nb), lambda g: (g, 0, 0)),
        scratch_shapes=scratch,
        compiler_params=pltpu.CompilerParams(
            dimension_semantics=("parallel",)),
    )(*inputs)
    return soi.reshape(N)


# -----------------------------------------------------------------------------
# Parameters (deterministic, in-script; mirrors nn.Conv2d shapes of __init__)
# -----------------------------------------------------------------------------
def init_params(key):
    layer_dims = [(3, 8), (8, 16), (16, 32), (32, 32), (32, 64)]
    params = []
    for i, (cin, cout) in enumerate(layer_dims):
        kw, kb = jax.random.split(jax.random.fold_in(key, i))
        fan_in = cin * 3 * 3
        bound = 1.0 / jnp.sqrt(fan_in)
        w = jax.random.uniform(kw, (3, 3, cin, cout), jnp.float32, -bound, bound)
        b = jax.random.uniform(kb, (cout,), jnp.float32, -bound, bound)
        params.append((w, b))
    return params


# -----------------------------------------------------------------------------
# Pure-JAX reference (f32) for correctness checking
# -----------------------------------------------------------------------------
def _conv_ref(x, w, b):
    y = jax.lax.conv_general_dilated(
        x, w, window_strides=(1, 1), padding="SAME",
        dimension_numbers=("NHWC", "HWIO", "NHWC"))
    return y + b.reshape(1, 1, 1, -1)


def reference_forward(x_nchw, params, stage):
    x = jnp.transpose(x_nchw, (0, 2, 3, 1)).astype(jnp.float32)
    for i in range(3):
        w, b = params[i]
        y = _conv_ref(x, w, b)
        if stage == i:
            return jnp.mean(jnp.abs(y), axis=(1, 2, 3))
        x = jnp.maximum(y, 0.0)


# -----------------------------------------------------------------------------
if __name__ == "__main__":
    key = jax.random.PRNGKey(0)
    kx, kp = jax.random.split(key)
    # PyTorch input x0: NCHW with 3 input channels (small test shape)
    x0 = jax.random.normal(kx, (2, 3, 16, 16), dtype=jnp.float32)
    params = init_params(kp)

    for stage in (0, 1, 2):
        soi = jax.block_until_ready(net_forward(x0, params, stage))
        ref = reference_forward(x0, params, stage)
        assert soi.shape == (2,)
        # bf16 matmul/activation inputs (f32 accumulation) -> loosened tolerance.
        assert jnp.allclose(soi, ref, atol=5e-3, rtol=2e-2), (stage, soi, ref)

    print("KERNEL_OK")
</pallas_src>

<mosaic_0001>
module attributes {stable_mosaic.version = 11 : i64} {
  func.func @_fused_conv_soi_kernel(%arg0: i32, %arg1: memref<1x3x580xbf16, #tpu.memory_space<vmem>>, %arg2: memref<1x324xf32, #tpu.memory_space<vmem>>, %arg3: memref<9x8x3xbf16, #tpu.memory_space<vmem>>, %arg4: memref<8x1xf32, #tpu.memory_space<vmem>>, %arg5: memref<1x1x1xf32, #tpu.memory_space<vmem>>) attributes {dimension_semantics = [#tpu.dimension_semantics<parallel>], iteration_bounds = array<i64: 2>, scalar_prefetch = 0 : i64, scratch_operands = 0 : i64, tpu.core_type = #tpu.core_type<tc>, window_params = [{transform_indices = @transform_0, window_bounds = array<i64: 1, 3, 580>}, {pipeline_mode = #tpu.pipeline_mode<synchronous>, transform_indices = @transform_1, window_bounds = array<i64: 1, 324>}, {pipeline_mode = #tpu.pipeline_mode<synchronous>, transform_indices = @transform_2, window_bounds = array<i64: 9, 8, 3>}, {pipeline_mode = #tpu.pipeline_mode<synchronous>, transform_indices = @transform_3, window_bounds = array<i64: 8, 1>}, {transform_indices = @transform_4, window_bounds = array<i64: 1, 1, 1>}]} {
    %c0 = arith.constant 0 : index
    %c0_0 = arith.constant 0 : index
    %0 = vector.load %arg2[%c0, %c0_0] : memref<1x324xf32, #tpu.memory_space<vmem>>, vector<1x324xf32>
    %cst = arith.constant 5.000000e-01 : f32
    %1 = vector.broadcast %cst : f32 to vector<1x324xf32>
    %2 = arith.cmpf ogt, %0, %1 : vector<1x324xf32>
    %c0_1 = arith.constant 0 : index
    %c0_2 = arith.constant 0 : index
    %c109 = arith.constant 109 : index
    %3 = vector.load %arg1[%c0_1, %c0_2, %c109] : memref<1x3x580xbf16, #tpu.memory_space<vmem>>, vector<1x3x324xbf16>
    %4 = vector.shape_cast %3 : vector<1x3x324xbf16> to vector<3x324xbf16>
    %c0_3 = arith.constant 0 : index
    %c0_4 = arith.constant 0 : index
    %c0_5 = arith.constant 0 : index
    %5 = vector.load %arg3[%c0_3, %c0_4, %c0_5] : memref<9x8x3xbf16, #tpu.memory_space<vmem>>, vector<1x8x3xbf16>
    %6 = vector.shape_cast %5 : vector<1x8x3xbf16> to vector<8x3xbf16>
    %cst_6 = arith.constant dense<0.000000e+00> : vector<8x324xf32>
    %7 = tpu.matmul %6, %4, %cst_6 {dimension_numbers = #tpu.dot_dimension_numbers<[1], [0], [0], [1], [0, 0, 1, 1], [], []>} : vector<8x3xbf16>, vector<3x324xbf16>, vector<8x324xf32> -> vector<8x324xf32>
    %c0_7 = arith.constant 0 : index
    %c0_8 = arith.constant 0 : index
    %c110 = arith.constant 110 : index
    %8 = vector.load %arg1[%c0_7, %c0_8, %c110] : memref<1x3x580xbf16, #tpu.memory_space<vmem>>, vector<1x3x324xbf16>
    %9 = vector.shape_cast %8 : vector<1x3x324xbf16> to vector<3x324xbf16>
    %c1 = arith.constant 1 : index
    %c0_9 = arith.constant 0 : index
    %c0_10 = arith.constant 0 : index
    %10 = vector.load %arg3[%c1, %c0_9, %c0_10] : memref<9x8x3xbf16, #tpu.memory_space<vmem>>, vector<1x8x3xbf16>
    %11 = vector.shape_cast %10 : vector<1x8x3xbf16> to vector<8x3xbf16>
    %cst_11 = arith.constant dense<0.000000e+00> : vector<8x324xf32>
    %12 = tpu.matmul %11, %9, %cst_11 {dimension_numbers = #tpu.dot_dimension_numbers<[1], [0], [0], [1], [0, 0, 1, 1], [], []>} : vector<8x3xbf16>, vector<3x324xbf16>, vector<8x324xf32> -> vector<8x324xf32>
    %13 = arith.addf %7, %12 : vector<8x324xf32>
    %c0_12 = arith.constant 0 : index
    %c0_13 = arith.constant 0 : index
    %c111 = arith.constant 111 : index
    %14 = vector.load %arg1[%c0_12, %c0_13, %c111] : memref<1x3x580xbf16, #tpu.memory_space<vmem>>, vector<1x3x324xbf16>
    %15 = vector.shape_cast %14 : vector<1x3x324xbf16> to vector<3x324xbf16>
    %c2 = arith.constant 2 : index
    %c0_14 = arith.constant 0 : index
    %c0_15 = arith.constant 0 : index
    %16 = vector.load %arg3[%c2, %c0_14, %c0_15] : memref<9x8x3xbf16, #tpu.memory_space<vmem>>, vector<1x8x3xbf16>
    %17 = vector.shape_cast %16 : vector<1x8x3xbf16> to vector<8x3xbf16>
    %cst_16 = arith.constant dense<0.000000e+00> : vector<8x324xf32>
    %18 = tpu.matmul %17, %15, %cst_16 {dimension_numbers = #tpu.dot_dimension_numbers<[1], [0], [0], [1], [0, 0, 1, 1], [], []>} : vector<8x3xbf16>, vector<3x324xbf16>, vector<8x324xf32> -> vector<8x324xf32>
    %19 = arith.addf %13, %18 : vector<8x324xf32>
    %c0_17 = arith.constant 0 : index
    %c0_18 = arith.constant 0 : index
    %c127 = arith.constant 127 : index
    %20 = vector.load %arg1[%c0_17, %c0_18, %c127] : memref<1x3x580xbf16, #tpu.memory_space<vmem>>, vector<1x3x324xbf16>
    %21 = vector.shape_cast %20 : vector<1x3x324xbf16> to vector<3x324xbf16>
    %c3 = arith.constant 3 : index
    %c0_19 = arith.constant 0 : index
    %c0_20 = arith.constant 0 : index
    %22 = vector.load %arg3[%c3, %c0_19, %c0_20] : memref<9x8x3xbf16, #tpu.memory_space<vmem>>, vector<1x8x3xbf16>
    %23 = vector.shape_cast %22 : vector<1x8x3xbf16> to vector<8x3xbf16>
    %cst_21 = arith.constant dense<0.000000e+00> : vector<8x324xf32>
    %24 = tpu.matmul %23, %21, %cst_21 {dimension_numbers = #tpu.dot_dimension_numbers<[1], [0], [0], [1], [0, 0, 1, 1], [], []>} : vector<8x3xbf16>, vector<3x324xbf16>, vector<8x324xf32> -> vector<8x324xf32>
    %25 = arith.addf %19, %24 : vector<8x324xf32>
    %c0_22 = arith.constant 0 : index
    %c0_23 = arith.constant 0 : index
    %c128 = arith.constant 128 : index
    %26 = vector.load %arg1[%c0_22, %c0_23, %c128] : memref<1x3x580xbf16, #tpu.memory_space<vmem>>, vector<1x3x324xbf16>
    %27 = vector.shape_cast %26 : vector<1x3x324xbf16> to vector<3x324xbf16>
    %c4 = arith.constant 4 : index
    %c0_24 = arith.constant 0 : index
    %c0_25 = arith.constant 0 : index
    %28 = vector.load %arg3[%c4, %c0_24, %c0_25] : memref<9x8x3xbf16, #tpu.memory_space<vmem>>, vector<1x8x3xbf16>
    %29 = vector.shape_cast %28 : vector<1x8x3xbf16> to vector<8x3xbf16>
    %cst_26 = arith.constant dense<0.000000e+00> : vector<8x324xf32>
    %30 = tpu.matmul %29, %27, %cst_26 {dimension_numbers = #tpu.dot_dimension_numbers<[1], [0], [0], [1], [0, 0, 1, 1], [], []>} : vector<8x3xbf16>, vector<3x324xbf16>, vector<8x324xf32> -> vector<8x324xf32>
    %31 = arith.addf %25, %30 : vector<8x324xf32>
    %c0_27 = arith.constant 0 : index
    %c0_28 = arith.constant 0 : index
    %c129 = arith.constant 129 : index
    %32 = vector.load %arg1[%c0_27, %c0_28, %c129] : memref<1x3x580xbf16, #tpu.memory_space<vmem>>, vector<1x3x324xbf16>
    %33 = vector.shape_cast %32 : vector<1x3x324xbf16> to vector<3x324xbf16>
    %c5 = arith.constant 5 : index
    %c0_29 = arith.constant 0 : index
    %c0_30 = arith.constant 0 : index
    %34 = vector.load %arg3[%c5, %c0_29, %c0_30] : memref<9x8x3xbf16, #tpu.memory_space<vmem>>, vector<1x8x3xbf16>
    %35 = vector.shape_cast %34 : vector<1x8x3xbf16> to vector<8x3xbf16>
    %cst_31 = arith.constant dense<0.000000e+00> : vector<8x324xf32>
    %36 = tpu.matmul %35, %33, %cst_31 {dimension_numbers = #tpu.dot_dimension_numbers<[1], [0], [0], [1], [0, 0, 1, 1], [], []>} : vector<8x3xbf16>, vector<3x324xbf16>, vector<8x324xf32> -> vector<8x324xf32>
    %37 = arith.addf %31, %36 : vector<8x324xf32>
    %c0_32 = arith.constant 0 : index
    %c0_33 = arith.constant 0 : index
    %c145 = arith.constant 145 : index
    %38 = vector.load %arg1[%c0_32, %c0_33, %c145] : memref<1x3x580xbf16, #tpu.memory_space<vmem>>, vector<1x3x324xbf16>
    %39 = vector.shape_cast %38 : vector<1x3x324xbf16> to vector<3x324xbf16>
    %c6 = arith.constant 6 : index
    %c0_34 = arith.constant 0 : index
    %c0_35 = arith.constant 0 : index
    %40 = vector.load %arg3[%c6, %c0_34, %c0_35] : memref<9x8x3xbf16, #tpu.memory_space<vmem>>, vector<1x8x3xbf16>
    %41 = vector.shape_cast %40 : vector<1x8x3xbf16> to vector<8x3xbf16>
    %cst_36 = arith.constant dense<0.000000e+00> : vector<8x324xf32>
    %42 = tpu.matmul %41, %39, %cst_36 {dimension_numbers = #tpu.dot_dimension_numbers<[1], [0], [0], [1], [0, 0, 1, 1], [], []>} : vector<8x3xbf16>, vector<3x324xbf16>, vector<8x324xf32> -> vector<8x324xf32>
    %43 = arith.addf %37, %42 : vector<8x324xf32>
    %c0_37 = arith.constant 0 : index
    %c0_38 = arith.constant 0 : index
    %c146 = arith.constant 146 : index
    %44 = vector.load %arg1[%c0_37, %c0_38, %c146] : memref<1x3x580xbf16, #tpu.memory_space<vmem>>, vector<1x3x324xbf16>
    %45 = vector.shape_cast %44 : vector<1x3x324xbf16> to vector<3x324xbf16>
    %c7 = arith.constant 7 : index
    %c0_39 = arith.constant 0 : index
    %c0_40 = arith.constant 0 : index
    %46 = vector.load %arg3[%c7, %c0_39, %c0_40] : memref<9x8x3xbf16, #tpu.memory_space<vmem>>, vector<1x8x3xbf16>
    %47 = vector.shape_cast %46 : vector<1x8x3xbf16> to vector<8x3xbf16>
    %cst_41 = arith.constant dense<0.000000e+00> : vector<8x324xf32>
    %48 = tpu.matmul %47, %45, %cst_41 {dimension_numbers = #tpu.dot_dimension_numbers<[1], [0], [0], [1], [0, 0, 1, 1], [], []>} : vector<8x3xbf16>, vector<3x324xbf16>, vector<8x324xf32> -> vector<8x324xf32>
    %49 = arith.addf %43, %48 : vector<8x324xf32>
    %c0_42 = arith.constant 0 : index
    %c0_43 = arith.constant 0 : index
    %c147 = arith.constant 147 : index
    %50 = vector.load %arg1[%c0_42, %c0_43, %c147] : memref<1x3x580xbf16, #tpu.memory_space<vmem>>, vector<1x3x324xbf16>
    %51 = vector.shape_cast %50 : vector<1x3x324xbf16> to vector<3x324xbf16>
    %c8 = arith.constant 8 : index
    %c0_44 = arith.constant 0 : index
    %c0_45 = arith.constant 0 : index
    %52 = vector.load %arg3[%c8, %c0_44, %c0_45] : memref<9x8x3xbf16, #tpu.memory_space<vmem>>, vector<1x8x3xbf16>
    %53 = vector.shape_cast %52 : vector<1x8x3xbf16> to vector<8x3xbf16>
    %cst_46 = arith.constant dense<0.000000e+00> : vector<8x324xf32>
    %54 = tpu.matmul %53, %51, %cst_46 {dimension_numbers = #tpu.dot_dimension_numbers<[1], [0], [0], [1], [0, 0, 1, 1], [], []>} : vector<8x3xbf16>, vector<3x324xbf16>, vector<8x324xf32> -> vector<8x324xf32>
    %55 = arith.addf %49, %54 : vector<8x324xf32>
    %c0_47 = arith.constant 0 : index
    %c0_48 = arith.constant 0 : index
    %56 = vector.load %arg4[%c0_47, %c0_48] : memref<8x1xf32, #tpu.memory_space<vmem>>, vector<8x1xf32>
    %57 = vector.broadcast %56 : vector<8x1xf32> to vector<8x324xf32>
    %58 = arith.addf %55, %57 : vector<8x324xf32>
    %59 = math.absf %58 : vector<8x324xf32>
    %cst_49 = arith.constant 0.000000e+00 : f32
    %60 = vector.shape_cast %2 : vector<1x324xi1> to vector<1x324xi1>
    %61 = vector.broadcast %60 : vector<1x324xi1> to vector<8x324xi1>
    %62 = vector.broadcast %cst_49 : f32 to vector<8x324xf32>
    %63 = arith.select %61, %59, %62 : vector<8x324xi1>, vector<8x324xf32>
    %64 = vector.shape_cast %63 : vector<8x324xf32> to vector<1x8x324xf32>
    %cst_50 = arith.constant dense<0.000000e+00> : vector<1xf32>
    %65 = vector.multi_reduction <add>, %64, %cst_50 [1, 2] : vector<1x8x324xf32> to vector<1xf32>
    %66 = vector.shape_cast %65 : vector<1xf32> to vector<1x1x1xf32>
    %67 = vector.extract %66[0, 0, 0] : f32 from vector<1x1x1xf32>
    %cst_51 = arith.constant 4.8828125E-4 : f32
    %68 = arith.mulf %67, %cst_51 : f32
    %69 = vector.broadcast %68 : f32 to vector<1x1x1xf32>
    %c0_52 = arith.constant 0 : index
    %c0_53 = arith.constant 0 : index
    %c0_54 = arith.constant 0 : index
    %70 = vector.load %arg5[%c0_52, %c0_53, %c0_54] : memref<1x1x1xf32, #tpu.memory_space<vmem>>, vector<1x1x1xf32>
    tpu.vector_store %arg5[%c0_52, %c0_53, %c0_54], %69 {strides = array<i32>} : memref<1x1x1xf32, #tpu.memory_space<vmem>>, vector<1x1x1xf32>,
    return
  }
  func.func @transform_0(%arg0: i32) -> (i32, i32, i32) {
    %c0_i32 = arith.constant 0 : i32
    %c0_i32_0 = arith.constant 0 : i32
    %c0_i32_1 = arith.constant 0 : i32
    return %arg0, %c0_i32, %c0_i32_0 : i32, i32, i32
  }
  func.func @transform_1(%arg0: i32) -> (i32, i32) {
    %c0_i32 = arith.constant 0 : i32
    %c0_i32_0 = arith.constant 0 : i32
    %c0_i32_1 = arith.constant 0 : i32
    return %c0_i32, %c0_i32_0 : i32, i32
  }
  func.func @transform_2(%arg0: i32) -> (i32, i32, i32) {
    %c0_i32 = arith.constant 0 : i32
    %c0_i32_0 = arith.constant 0 : i32
    %c0_i32_1 = arith.constant 0 : i32
    %c0_i32_2 = arith.constant 0 : i32
    return %c0_i32, %c0_i32_0, %c0_i32_1 : i32, i32, i32
  }
  func.func @transform_3(%arg0: i32) -> (i32, i32) {
    %c0_i32 = arith.constant 0 : i32
    %c0_i32_0 = arith.constant 0 : i32
    %c0_i32_1 = arith.constant 0 : i32
    return %c0_i32, %c0_i32_0 : i32, i32
  }
  func.func @transform_4(%arg0: i32) -> (i32, i32, i32) {
    %c0_i32 = arith.constant 0 : i32
    %c0_i32_0 = arith.constant 0 : i32
    %c0_i32_1 = arith.constant 0 : i32
    return %arg0, %c0_i32, %c0_i32_0 : i32, i32, i32
  }
}

</mosaic_0001>

<bundles_post_ra>
// kernel: net_forward.1
= control target key start
LH: loop header
LB: loop body
LE: loop exit
PB: predicated region body
PF: predicated region fallthrough
CT: control target
= control target key end

     0   :  { %s1586_s15 = smov 0   ;;  %s1772_s0 = inlined_call_operand.vmem [shape: bf16[2,3,580], index: 0, kind: input, shape index: {}]   ;;  %s1773_s1 = inlined_call_operand.vmem [shape: f32[1,324], index: 1, kind: input, shape index: {}]   ;;  %s1774_s2 = inlined_call_operand.vmem [shape: bf16[9,8,3], index: 2, kind: input, shape index: {}]   ;;  %s1775_s3 = inlined_call_operand.vmem [shape: f32[8,1], index: 3, kind: input, shape index: {}]   ;;  %s1776_s4 = inlined_call_operand.vmem [shape: f32[2,1,1], index: 4, kind: output, shape index: {}]  }
   0x1 LB: > { %s1403_s16 = sadd.s32 4294967295, %s1546_s15   ;;  %p1407_p0 = scmp.ge.s32.totalorder %s1546_s15, 1  ;;  %s1546_s15 = sphi %s1586_s15, %s14_s15  }
   0x2   : > { %p162_p1 = scmp.lt.s32.totalorder %s1546_s15, 3 }
   0x4   : > { %p163_p2 = pnand %p1407_p0, %p162_p1 }
   0x5   : > { %p186_p3 = scmp.lt.s32.totalorder (!%p163_p2), %s1403_s16, 1  ;;  %s1551_s21 = smov (!%p163_p2), 18  }
   0x6   : > { %166 = sbr.rel (%p163_p2) target bundleno = 622 (0x26e), region = 36  ;;  %s1553_s22 = smov (!%p163_p2), 19  }
   0x7   : > { %s1554_s23 = smov (!%p163_p2), 17   ;;  %s1555_s24 = smov (!%p163_p2), 1  }
   0x8   : > { %s1556_s25 = smov (!%p163_p2), 127   ;;  %s1557_s26 = smov (!%p163_p2), 111  }
   0x9   : > { %s1558_s27 = smov (!%p163_p2), 110   ;;  %s1559_s28 = smov (!%p163_p2), 109  }
   0xb   : > { %v206_v0 = vlaneseq  ;;  %v1548_v1 = vmov 1983009808   ;;  %s1778_s16 = smov (!%p186_p3, %s1403_s16), 1  ;;  %v1549_v5 = vmov 0.0   ;;  %vm1550_vm0 = vmmov 0   ;;  %v1308_v38 = vld [vmem:[%s1775_s3] sm:$0xff] }
   0xc   : > { %v204_v2 = vunpack.c.l.s4 %v1548_v1  ;;  %s1509_s17 = smul.u32 10, %s1778_s16  ;;  %1455 = vmatprep.subr.bf16.mxu1 %v1549_v5  ;;  %1457 = vmatprep.mubr.msk.bf16.mxu1 %vm1550_vm0, %v1549_v5  ;;  %v1552_v13 = vmov 0   ;;  %vm235_vm1 = vcmask 1040384   ;;  %vm227_vm2 = vcmask 146432   ;;  %v1409_v54 = vld [vmem:[%s1774_s2 + $0x4] sm:$0xf]  ;;  %s193_s30 = scalar_lea.vmem %s1776_s4, %s1778_s16 }
   0xd   : > { %v1596_v3 = vshrl.u32 %v206_v0, 7  ;;  %280 = vmatprep.mubr.bf16.mxu0 %v1552_v13  ;;  %1533 = vset.pattern.permute.xlu0 %v1552_v13  ;;  %vm236_vm3 = vcmask 1041408   ;;  %v1560_v41 = vmov 65535   ;;  %vm337_vm4 = vcmask 154624   ;;  %v198_v1 = vld [vmem:[%s1774_s2] sm:$0xf] }
   0xe   : > { %v205_v4 = vunpack.c.0.s8 %v204_v2  ;;  %s1606_s20 = scalar_lea.vmem %s1772_s0, %s1509_s17  ;;  %v237_v42 = vsel %vm235_vm1, 4294967295, %v1560_v41  ;;  %vm231_vm5 = vcmask 23552   ;;  %vm463_vm6 = vcmask 138240  }
   0xf   : > { %v197_v7 = vld [vmem:[%s1606_s20] sm:$0xff]  ;;  %v1637_v46 = vsel %vm236_vm3, %v237_v42, 0  ;;  %vm592_vm7 = vcmask 7168   ;;  %vm834_vm8 = vcmask 1039360   ;;  %vm959_vm9 = vcmask 908288  }
  0x10   : > { %v1601_v6 = vsub.s32 %v205_v4, %v1596_v3  ;;  %v202_v9 = vcombine.high %v197_v7, %v197_v7  ;;  %v692_v14 = vld [vmem:[%s1606_s20 + $0x2] sm:$0x3f]  ;;  %vm1084_vm10 = vcmask 900096   ;;  %vm1209_vm11 = vcmask 891904  }
  0x11   : > { %v696_v15 = vcombine.high %v692_v14, %v692_v14  ;;  %v808_v17 = vld [vmem:[%s1606_s20 + $0x2] sm:$0x3f]  ;;  %vm1354_vm1 = vcmask 0  }
  0x12   : > { %v209_v8 = vrot.slane %v197_v7, %v1601_v6  ;;  %v216_v10 = vrot.slane %v202_v9, %v1601_v6  ;;  %v1617_v16 = vrot.slane %v692_v14, %v1601_v6  ;;  %v812_v18 = vcombine.high %v808_v17, %v808_v17  ;;  %v933_v20 = vld [vmem:[%s1606_s20 + $0x2] sm:$0x3f] }
  0x13   : > { %v1621_v19 = vrot.slane %v696_v15, %v1601_v6  ;;  %v819_v21 = vrot.slane %v808_v17, %v1601_v6  ;;  %v944_v23 = vrot.slane %v933_v20, %v1601_v6  ;;  %v937_v26 = vcombine.high %v933_v20, %v933_v20  ;;  %v1058_v27 = vld [vmem:[%s1606_s20 + $0x2] sm:$0x3f]  ;;  %v1414_v15 = vld [vmem:[%s1774_s2 + $0x8] sm:$0xf] }
  0x14   : > { %219 = vrot.lane.b32.xlu1 %v209_v8, %s1551_s21  ;;  %v217_v11 = vcombine.high %v209_v8, %v209_v8  ;;  %v218_v12 = vcombine.high %v216_v10, %v216_v10  ;;  %v826_v22 = vrot.slane %v812_v18, %v1601_v6  ;;  %v1062_v28 = vcombine.high %v1058_v27, %v1058_v27  ;;  %v1183_v29 = vld [vmem:[%s1606_s20 + $0x2] sm:$0x3f] }
  0x15   : > { %v827_v24 = vcombine.high %v819_v21, %v819_v21  ;;  %v952_v25 = vcombine.high %v944_v23, %v944_v23  ;;  %v951_v30 = vrot.slane %v937_v26, %v1601_v6  ;;  %v1069_v31 = vrot.slane %v1058_v27, %v1601_v6 }
  0x16   : > { %221 = vrot.lane.b32.xlu0 %v217_v11, %s1551_s21  ;;  %v1076_v32 = vrot.slane %v1062_v28, %v1601_v6  ;;  %v1194_v33 = vrot.slane %v1183_v29, %v1601_v6  ;;  %v1187_v36 = vcombine.high %v1183_v29, %v1183_v29  ;;  %v711_v18 = vcombine.high %v1617_v16, %v1617_v16  ;;  %v1417_v29 = vld [vmem:[%s1774_s2 + $0xc] sm:$0xf] }
  0x17   : > { %v1077_v34 = vcombine.high %v1069_v31, %v1069_v31 }
  0x18   : > { %225 = vrot.lane.b32.xlu1 %v218_v12, %s1551_s21  ;;  %v1202_v35 = vcombine.high %v1194_v33, %v1194_v33  ;;  %v1201_v37 = vrot.slane %v1187_v36, %v1601_v6  ;;  %v719_v26 = vand.u32 %v711_v18, %v1637_v46 }
  0x1a   : > { %223 = vrot.lane.b32.xlu0 %v216_v10, %s1551_s21 }
  0x1c   : > { %333 = vrot.lane.b32.xlu1 %v216_v10, %s1553_s22 }
  0x1e   : > { %331 = vrot.lane.b32.xlu0 %v217_v11, %s1553_s22 }
  0x20   : > { %335 = vrot.lane.b32.xlu1 %v218_v12, %s1553_s22 }
  0x22   : > { %329 = vrot.lane.b32.xlu0 %v209_v8, %s1553_s22 }
  0x24   : > { %459 = vrot.lane.b32.xlu1 %v216_v10, %s1554_s23 }
  0x26   : > { %457 = vrot.lane.b32.xlu0 %v217_v11, %s1554_s23 }
  0x28   : > { %461 = vrot.lane.b32.xlu1 %v218_v12, %s1554_s23 }
  0x2a   : > { %455 = vrot.lane.b32.xlu0 %v209_v8, %s1554_s23 }
  0x2c   : > { %588 = vrot.lane.b32.xlu1 %v216_v10, %s1555_s24 }
  0x2e   : > { %586 = vrot.lane.b32.xlu0 %v217_v11, %s1555_s24 }
  0x30   : > { %590 = vrot.lane.b32.xlu1 %v218_v12, %s1555_s24 }
  0x32   : > { %584 = vrot.lane.b32.xlu0 %v209_v8, %s1555_s24 }
  0x34   : > { %832 = vrot.lane.b32.xlu1 %v826_v22, %s1556_s25 }
  0x36   : > { %830 = vrot.lane.b32.xlu0 %v827_v24, %s1556_s25 }
  0x38   : > { %955 = vrot.lane.b32.xlu1 %v952_v25, %s1557_s26 }
  0x3a   : > { %828 = vrot.lane.b32.xlu0 %v819_v21, %s1556_s25 }
  0x3c   : > { %953 = vrot.lane.b32.xlu1 %v944_v23, %s1557_s26 }
  0x3e   : > { %957 = vrot.lane.b32.xlu0 %v951_v30, %s1557_s26 }
  0x40   : > { %1082 = vrot.lane.b32.xlu1 %v1076_v32, %s1558_s27 }
  0x42   : > { %1080 = vrot.lane.b32.xlu0 %v1077_v34, %s1558_s27 }
  0x44   : > { %1205 = vrot.lane.b32.xlu1 %v1202_v35, %s1559_s28 }
  0x46   : > { %1078 = vrot.lane.b32.xlu0 %v1069_v31, %s1558_s27  ;;  %v722_v31 = vand.u32 %v1621_v19, %v1637_v46 }
  0x48   : > { %1203 = vrot.lane.b32.xlu1 %v1194_v33, %s1559_s28  ;;  %v716_v33 = vand.u32 %v1617_v16, %v1637_v46 }
  0x4a   : > { %1207 = vrot.lane.b32.xlu0 %v1201_v37, %s1559_s28  ;;  %v1420_v37 = vld [vmem:[%s1774_s2 + $0x10] sm:$0xf] }
  0x4e   : > { %1311 = vperm.xlu0 %1533, %v1308_v38  }
  0x86   : > { %v220_v39 = vpop.permute.xlu1 %219 }
  0x88   : > { %v222_v40 = vpop.permute.xlu0 %221 }
  0x89   : > { %v228_v44 = vsel %vm227_vm2, %v220_v39, %v222_v40 }
  0x8a   : > { %v226_v43 = vpop.permute.xlu1 %225  ;;  %v240_v52 = vand.u32 %v1637_v46, %v228_v44 }
  0x8c   : > { %v224_v45 = vpop.permute.xlu0 %223 }
  0x8d   : > { %v230_v47 = vsel %vm227_vm2, %v224_v45, %v226_v43  ;;  %v229_v48 = vsel %vm227_vm2, %v222_v40, %v224_v45 }
  0x8e   : > { %v334_v49 = vpop.permute.xlu1 %333  ;;  %v243_v50 = vand.u32 %v1637_v46, %v229_v48  ;;  %v246_v51 = vand.u32 %v1637_v46, %v230_v47 }
  0x90   : > { %262 = vmatprep.subr.bf16.mxu0 %v243_v50  ;;  %v332_v53 = vpop.permute.xlu0 %331  ;;  %1456 = vmatpush3.bf16.msra.mxu1 %v246_v51 }
  0x91   : > { %v339_v55 = vsel %vm337_vm4, %v332_v53, %v334_v49  ;;  %263 = vmatpush1.bf16.msra.mxu0 %v240_v52  ;;  %1461 = vmatprep.subr.bf16.mxu1 %v1549_v5 }
  0x92   : > { %v348_v56 = vand.u32 %v339_v55, %v1637_v46  ;;  %v336_v57 = vpop.permute.xlu1 %335 }
  0x93   : > { %1458 = vmatmul.mubr.msk.bf16.vlgmr.msra.gmra.mxu1 %vm231_vm5, %v1409_v54  ;;  %v340_v58 = vsel %vm337_vm4, %v334_v49, %v336_v57  ;;  %v1423_v49 = vld [vmem:[%s1774_s2 + $0x14] sm:$0xf] }
  0x94   : > { %v351_v59 = vand.u32 %v340_v58, %v1637_v46  ;;  %1410 = vmatmul.mubr.msk.bf16.vlgmr.msra.gmra.mxu0 %vm231_vm5, %v1409_v54  ;;  %v330_v60 = vpop.permute.xlu0 %329  ;;  %367 = vmatprep.subr.bf16.mxu0 %v348_v56  ;;  %v1426_v58 = vld [vmem:[%s1774_s2 + $0x18] sm:$0xf] }
  0x95   : > { %v338_v61 = vsel %vm337_vm4, %v330_v60, %v332_v53  ;;  %1463 = vmatprep.mubr.msk.bf16.mxu1 %vm1550_vm0, %v1549_v5  ;;  %385 = vmatprep.mubr.bf16.mxu0 %v1552_v13 }
  0x96   : > { %v345_v62 = vand.u32 %v338_v61, %v1637_v46  ;;  %1462 = vmatpush3.bf16.msra.mxu1 %v351_v59  ;;  %v460_v63 = vpop.permute.xlu1 %459 }
  0x97   : > { %1467 = vmatprep.subr.bf16.mxu1 %v1549_v5 }
  0x98   : > { %v458_v0 = vpop.permute.xlu0 %457  ;;  %368 = vmatpush1.bf16.msra.mxu0 %v345_v62 }
  0x99   : > { %v465_v2 = vsel %vm463_vm6, %v458_v0, %v460_v63 }
  0x9a   : > { %v474_v4 = vand.u32 %v465_v2, %v1637_v46  ;;  %v462_v6 = vpop.permute.xlu1 %461  ;;  %v1432_v2 = vld [vmem:[%s1774_s2 + $0x20] sm:$0xf] }
  0x9b   : > { %1464 = vmatmul.mubr.msk.bf16.vlgmr.msra.gmra.mxu1 %vm231_vm5, %v198_v1  ;;  %v466_v7 = vsel %vm463_vm6, %v460_v63, %v462_v6 }
  0x9c   : > { %v477_v8 = vand.u32 %v466_v7, %v1637_v46  ;;  %v456_v9 = vpop.permute.xlu0 %455  ;;  %1412 = vmatmul.mubr.msk.bf16.vlgmr.msra.gmra.mxu0 %vm231_vm5, %v198_v1  ;;  %493 = vmatprep.subr.bf16.mxu0 %v474_v4 }
  0x9d   : > { %v464_v10 = vsel %vm463_vm6, %v456_v9, %v458_v0  ;;  %1469 = vmatprep.mubr.msk.bf16.mxu1 %vm1550_vm0, %v1549_v5  ;;  %511 = vmatprep.mubr.bf16.mxu0 %v1552_v13  ;;  %v1429_v0 = vld [vmem:[%s1774_s2 + $0x1c] sm:$0xf] }
  0x9e   : > { %v471_v11 = vand.u32 %v464_v10, %v1637_v46  ;;  %1468 = vmatpush3.bf16.msra.mxu1 %v477_v8  ;;  %v589_v12 = vpop.permute.xlu1 %588 }
  0x9f   : > { %1473 = vmatprep.subr.bf16.mxu1 %v1549_v5 }
  0xa0   : > { %v587_v14 = vpop.permute.xlu0 %586  ;;  %494 = vmatpush1.bf16.msra.mxu0 %v471_v11 }
  0xa1   : > { %v594_v17 = vsel %vm592_vm7, %v587_v14, %v589_v12 }
  0xa2   : > { %v603_v20 = vand.u32 %v594_v17, %v1637_v46  ;;  %v591_v21 = vpop.permute.xlu1 %590 }
  0xa3   : > { %1470 = vmatmul.mubr.msk.bf16.vlgmr.msra.gmra.mxu1 %vm231_vm5, %v1414_v15  ;;  %v595_v22 = vsel %vm592_vm7, %v589_v12, %v591_v21 }
  0xa4   : > { %v606_v23 = vand.u32 %v595_v22, %v1637_v46  ;;  %v585_v24 = vpop.permute.xlu0 %584  ;;  %1415 = vmatmul.mubr.msk.bf16.vlgmr.msra.gmra.mxu0 %vm231_vm5, %v1414_v15  ;;  %622 = vmatprep.subr.bf16.mxu0 %v603_v20 }
  0xa5   : > { %v593_v25 = vsel %vm592_vm7, %v585_v24, %v587_v14  ;;  %1475 = vmatprep.mubr.msk.bf16.mxu1 %vm1550_vm0, %v1549_v5  ;;  %640 = vmatprep.mubr.bf16.mxu0 %v1552_v13 }
  0xa6   : > { %v600_v27 = vand.u32 %v593_v25, %v1637_v46  ;;  %1474 = vmatpush3.bf16.msra.mxu1 %v606_v23  ;;  %v833_v28 = vpop.permute.xlu1 %832 }
  0xa7   : > { %1479 = vmatprep.subr.bf16.mxu1 %v1549_v5  ;;  %v847_v16 = vand.u32 %v833_v28, %v1637_v46 }
  0xa8   : > { %623 = vmatpush1.bf16.msra.mxu0 %v600_v27  ;;  %v831_v30 = vpop.permute.xlu0 %830 }
  0xa9   : > { %738 = vmatprep.subr.bf16.mxu0 %v719_v26  ;;  %v836_v32 = vsel %vm834_vm8, %v831_v30, %v833_v28 }
  0xaa   : > { %v844_v34 = vand.u32 %v836_v32, %v1637_v46  ;;  %v956_v35 = vpop.permute.xlu1 %955 }
  0xab   : > { %1476 = vmatmul.mubr.msk.bf16.vlgmr.msra.gmra.mxu1 %vm231_vm5, %v1417_v29 }
  0xac   : > { %1418 = vmatmul.mubr.msk.bf16.vlgmr.msra.gmra.mxu0 %vm231_vm5, %v1417_v29  ;;  %v829_v36 = vpop.permute.xlu0 %828  ;;  %1480 = vmatpush3.bf16.msra.mxu1 %v722_v31 }
  0xad   : > { %739 = vmatpush1.bf16.msra.mxu0 %v716_v33  ;;  %1481 = vmatprep.mubr.msk.bf16.mxu1 %vm1550_vm0, %v1549_v5  ;;  %v835_v19 = vsel %vm834_vm8, %v829_v36, %v831_v30 }
  0xae   : > { %756 = vmatprep.mubr.bf16.mxu0 %v1552_v13  ;;  %863 = vmatprep.subr.bf16.mxu0 %v844_v34  ;;  %v954_v39 = vpop.permute.xlu1 %953  ;;  %v841_v40 = vand.u32 %v835_v19, %v1637_v46 }
  0xaf   : > { %1485 = vmatprep.subr.bf16.mxu1 %v1549_v5  ;;  %v960_v45 = vsel %vm959_vm9, %v954_v39, %v956_v35 }
  0xb0   : > { %v958_v38 = vpop.permute.xlu0 %957  ;;  %v966_v51 = vand.u32 %v960_v45, %v1637_v46 }
  0xb1   : > { %v961_v41 = vsel %vm959_vm9, %v956_v35, %v958_v38  ;;  %v972_v48 = vand.u32 %v958_v38, %v1637_v46 }
  0xb2   : > { %v969_v42 = vand.u32 %v961_v41, %v1637_v46  ;;  %v1083_v44 = vpop.permute.xlu1 %1082 }
  0xb3   : > { %1482 = vmatmul.mubr.msk.bf16.vlgmr.msra.gmra.mxu1 %vm231_vm5, %v1420_v37  ;;  %v1097_v57 = vand.u32 %v1083_v44, %v1637_v46 }
  0xb4   : > { %1421 = vmatmul.mubr.msk.bf16.vlgmr.msra.gmra.mxu0 %vm231_vm5, %v1420_v37  ;;  %1486 = vmatpush3.bf16.msra.mxu1 %v847_v16  ;;  %v1081_v43 = vpop.permute.xlu0 %1080 }
  0xb5   : > { %864 = vmatpush1.bf16.msra.mxu0 %v841_v40  ;;  %1487 = vmatprep.mubr.msk.bf16.mxu1 %vm1550_vm0, %v1549_v5  ;;  %v1086_v47 = vsel %vm1084_vm10, %v1081_v43, %v1083_v44 }
  0xb6   : > { %881 = vmatprep.mubr.bf16.mxu0 %v1552_v13  ;;  %988 = vmatprep.subr.bf16.mxu0 %v969_v42  ;;  %v1094_v52 = vand.u32 %v1086_v47, %v1637_v46  ;;  %v1206_v54 = vpop.permute.xlu1 %1205 }
  0xb7   : > { %1491 = vmatprep.subr.bf16.mxu1 %v1549_v5 }
  0xb8   : > { %v1079_v50 = vpop.permute.xlu0 %1078 }
  0xb9   : > { %v1085_v55 = vsel %vm1084_vm10, %v1079_v50, %v1081_v43 }
  0xba   : > { %v1091_v59 = vand.u32 %v1085_v55, %v1637_v46  ;;  %v1204_v61 = vpop.permute.xlu1 %1203 }
  0xbb   : > { %1488 = vmatmul.mubr.msk.bf16.vlgmr.msra.gmra.mxu1 %vm231_vm5, %v1423_v49  ;;  %v1210_v62 = vsel %vm1209_vm11, %v1204_v61, %v1206_v54 }
  0xbc   : > { %1424 = vmatmul.mubr.msk.bf16.vlgmr.msra.gmra.mxu0 %vm231_vm5, %v1423_v49  ;;  %1492 = vmatpush3.bf16.msra.mxu1 %v972_v48  ;;  %v1208_v53 = vpop.permute.xlu0 %1207  ;;  %v1216_v1 = vand.u32 %v1210_v62, %v1637_v46 }
  0xbd   : > { %989 = vmatpush1.bf16.msra.mxu0 %v966_v51  ;;  %1493 = vmatprep.mubr.msk.bf16.mxu1 %vm1550_vm0, %v1549_v5  ;;  %v1211_v56 = vsel %vm1209_vm11, %v1206_v54, %v1208_v53  ;;  %v1222_v63 = vand.u32 %v1208_v53, %v1637_v46 }
  0xbe   : > { %1006 = vmatprep.mubr.bf16.mxu0 %v1552_v13  ;;  %1113 = vmatprep.subr.bf16.mxu0 %v1094_v52  ;;  %v1219_v60 = vand.u32 %v1211_v56, %v1637_v46 }
  0xbf   : > { %1497 = vmatprep.subr.bf16.mxu1 %v1549_v5 }
  0xc3   : > { %1494 = vmatmul.mubr.msk.bf16.vlgmr.msra.gmra.mxu1 %vm231_vm5, %v1426_v58 }
  0xc4   : > { %1427 = vmatmul.mubr.msk.bf16.vlgmr.msra.gmra.mxu0 %vm231_vm5, %v1426_v58  ;;  %1498 = vmatpush3.bf16.msra.mxu1 %v1097_v57 }
  0xc5   : > { %1114 = vmatpush1.bf16.msra.mxu0 %v1091_v59  ;;  %1499 = vmatprep.mubr.msk.bf16.mxu1 %vm1550_vm0, %v1549_v5 }
  0xc6   : > { %1131 = vmatprep.mubr.bf16.mxu0 %v1552_v13  ;;  %1238 = vmatprep.subr.bf16.mxu0 %v1219_v60 }
  0xc7   : > { %1503 = vmatprep.subr.bf16.mxu1 %v1549_v5 }
  0xcb   : > { %1500 = vmatmul.mubr.msk.bf16.vlgmr.msra.gmra.mxu1 %vm231_vm5, %v1429_v0 }
  0xcc   : > { %1430 = vmatmul.mubr.msk.bf16.vlgmr.msra.gmra.mxu0 %vm231_vm5, %v1429_v0  ;;  %1504 = vmatpush3.bf16.msra.mxu1 %v1222_v63 }
  0xcd   : > { %1239 = vmatpush1.bf16.msra.mxu0 %v1216_v1  ;;  %1505 = vmatprep.mubr.msk.bf16.mxu1 %vm1550_vm0, %v1549_v5  ;;  %vm1340_vm0 = vcmask 556032  }
  0xce   : > { %1256 = vmatprep.mubr.bf16.mxu0 %v1552_v13 }
  0xd3   : > { %1506 = vmatmul.mubr.msk.bf16.vlgmr.msra.gmra.mxu1 %vm231_vm5, %v1432_v2 }
  0xd4   : > { %1433 = vmatmul.mubr.msk.bf16.vlgmr.msra.gmra.mxu0 %vm231_vm5, %v1432_v2 }
 0x153   : > { %v323_v46 = vpop.f32.mrf.mxu1 }
 0x154   : > { %v282_v4 = vpop.f32.mrf.mxu0 }
 0x155   : > { %v1459_v6 = vpop.f32.mrf.mxu1 }
 0x156   : > { %v284_v7 = vpop.f32.mrf.mxu0 }
 0x157   : > { %v326_v8 = vpop.f32.mrf.mxu1 }
 0x158   : > { %v286_v9 = vpop.f32.mrf.mxu0 }
 0x159   : > { %v1460_v10 = vpop.f32.mrf.mxu1 }
 0x15a   : > { %v287_v11 = vpop.f32.mrf.mxu0 }
 0x15b   : > { %v428_v12 = vpop.f32.mrf.mxu1 }
 0x15c   : > { %v387_v5 = vpop.f32.mrf.mxu0  ;;  %v429_v56 = vadd.f32 %v428_v12, %v323_v46 }
 0x15d   : > { %v1465_v14 = vpop.f32.mrf.mxu1  ;;  %v388_v58 = vadd.f32 %v387_v5, %v282_v4 }
 0x15e   : > { %v389_v15 = vpop.f32.mrf.mxu0  ;;  %v195_v14 = vld [vmem:[%s1773_s1] sm:$0x7] }
 0x15f   : > { %v431_v17 = vpop.f32.mrf.mxu1  ;;  %v390_v62 = vadd.f32 %v389_v15, %v284_v7  ;;  %vm196_vm12 = vcmp.gt.f32.partialorder %v195_v14, 0.5 }
 0x160   : > { %v391_v18 = vpop.f32.mrf.mxu0 }
 0x161   : > { %v1466_v20 = vpop.f32.mrf.mxu1 }
 0x162   : > { %v392_v21 = vpop.f32.mrf.mxu0 }
 0x163   : > { %v554_v22 = vpop.f32.mrf.mxu1 }
 0x164   : > { %v513_v23 = vpop.f32.mrf.mxu0  ;;  %v562_v60 = vadd.f32 %v554_v22, %v429_v56 }
 0x165   : > { %v1471_v24 = vpop.f32.mrf.mxu1  ;;  %v560_v63 = vadd.f32 %v513_v23, %v388_v58 }
 0x166   : > { %v515_v25 = vpop.f32.mrf.mxu0 }
 0x167   : > { %v557_v26 = vpop.f32.mrf.mxu1  ;;  %v561_v6 = vadd.f32 %v515_v25, %v390_v62  ;;  %v1331_v25 = vsub.s32 2, %v1596_v3 }
 0x168   : > { %v517_v27 = vpop.f32.mrf.mxu0 }
 0x169   : > { %v1472_v28 = vpop.f32.mrf.mxu1 }
 0x16a   : > { %v518_v29 = vpop.f32.mrf.mxu0  ;;  %v1320_v28 = vsel %vm196_vm12, 1, %v1552_v13 }
 0x16b   : > { %v683_v30 = vpop.f32.mrf.mxu1  ;;  %v1323_v29 = vsub.s32 0, %v1596_v3 }
 0x16c   : > { %v642_v31 = vpop.f32.mrf.mxu0  ;;  %v691_v1 = vadd.f32 %v683_v30, %v562_v60  ;;  %v1327_v30 = vsub.s32 1, %v1596_v3 }
 0x16d   : > { %v1477_v32 = vpop.f32.mrf.mxu1  ;;  %v689_v8 = vadd.f32 %v642_v31, %v560_v63 }
 0x16e   : > { %v644_v33 = vpop.f32.mrf.mxu0 }
 0x16f   : > { %v686_v34 = vpop.f32.mrf.mxu1  ;;  %v690_v46 = vadd.f32 %v644_v33, %v561_v6 }
 0x170   : > { %v646_v35 = vpop.f32.mrf.mxu0  ;;  %v1312_v34 = vpop.permute.xlu0 %1311 }
 0x171   : > { %v1478_v36 = vpop.f32.mrf.mxu1 }
 0x172   : > { %v647_v19 = vpop.f32.mrf.mxu0 }
 0x173   : > { %v799_v16 = vpop.f32.mrf.mxu1 }
 0x174   : > { %v758_v37 = vpop.f32.mrf.mxu0  ;;  %v807_v10 = vadd.f32 %v799_v16, %v691_v1 }
 0x175   : > { %v1483_v38 = vpop.f32.mrf.mxu1  ;;  %v805_v12 = vadd.f32 %v758_v37, %v689_v8 }
 0x176   : > { %v760_v39 = vpop.f32.mrf.mxu0  ;;  %v1332_v38 = vrot.slane %v1320_v28, %v1331_v25 }
 0x177   : > { %v802_v40 = vpop.f32.mrf.mxu1  ;;  %v806_v18 = vadd.f32 %v760_v39, %v690_v46  ;;  %v1324_v39 = vrot.slane %v1320_v28, %v1323_v29 }
 0x178   : > { %v762_v41 = vpop.f32.mrf.mxu0  ;;  %vm1335_vm13 = vcmp.eq.s32.totalorder %v1332_v38, 1 }
 0x179   : > { %v1484_v42 = vpop.f32.mrf.mxu1  ;;  %vm1333_vm14 = vcmp.eq.s32.totalorder %v1324_v39, 1 }
 0x17a   : > { %v763_v43 = vpop.f32.mrf.mxu0  ;;  %v1328_v42 = vrot.slane %v1320_v28, %v1327_v30 }
 0x17b   : > { %v924_v44 = vpop.f32.mrf.mxu1 }
 0x17c   : > { %v883_v45 = vpop.f32.mrf.mxu0  ;;  %v932_v5 = vadd.f32 %v924_v44, %v807_v10  ;;  %vm1334_vm15 = vcmp.eq.s32.totalorder %v1328_v42, 1 }
 0x17d   : > { %v1489_v47 = vpop.f32.mrf.mxu1  ;;  %v930_v7 = vadd.f32 %v883_v45, %v805_v12 }
 0x17e   : > { %v885_v48 = vpop.f32.mrf.mxu0 }
 0x17f   : > { %v927_v49 = vpop.f32.mrf.mxu1  ;;  %v931_v22 = vadd.f32 %v885_v48, %v806_v18 }
 0x180   : > { %v887_v50 = vpop.f32.mrf.mxu0 }
 0x181   : > { %v1490_v51 = vpop.f32.mrf.mxu1 }
 0x182   : > { %v888_v52 = vpop.f32.mrf.mxu0 }
 0x183   : > { %v1049_v53 = vpop.f32.mrf.mxu1 }
 0x184   : > { %v1008_v54 = vpop.f32.mrf.mxu0  ;;  %v1057_v20 = vadd.f32 %v1049_v53, %v932_v5 }
 0x185   : > { %v1495_v55 = vpop.f32.mrf.mxu1  ;;  %v1055_v23 = vadd.f32 %v1008_v54, %v930_v7 }
 0x186   : > { %v1010_v57 = vpop.f32.mrf.mxu0 }
 0x187   : > { %v1052_v59 = vpop.f32.mrf.mxu1  ;;  %v1056_v31 = vadd.f32 %v1010_v57, %v931_v22 }
 0x188   : > { %v1012_v61 = vpop.f32.mrf.mxu0 }
 0x189   : > { %v1496_v0 = vpop.f32.mrf.mxu1 }
 0x18a   : > { %v1013_v2 = vpop.f32.mrf.mxu0 }
 0x18b   : > { %v1174_v9 = vpop.f32.mrf.mxu1 }
 0x18c   : > { %v1133_v11 = vpop.f32.mrf.mxu0  ;;  %v1182_v26 = vadd.f32 %v1174_v9, %v1057_v20 }
 0x18d   : > { %v1501_v4 = vpop.f32.mrf.mxu1  ;;  %v1180_v32 = vadd.f32 %v1133_v11, %v1055_v23 }
 0x18e   : > { %v1135_v17 = vpop.f32.mrf.mxu0 }
 0x18f   : > { %v1177_v15 = vpop.f32.mrf.mxu1  ;;  %v1181_v19 = vadd.f32 %v1135_v17, %v1056_v31 }
 0x190   : > { %v1137_v21 = vpop.f32.mrf.mxu0 }
 0x191   : > { %v1502_v24 = vpop.f32.mrf.mxu1 }
 0x192   : > { %v1138_v27 = vpop.f32.mrf.mxu0 }
 0x193   : > { %v1299_v33 = vpop.f32.mrf.mxu1 }
 0x194   : > { %v1307_v35 = vadd.f32 %v1299_v33, %v1182_v26  ;;  %v1258_v36 = vpop.f32.mrf.mxu0 }
 0x195   : > { %v1305_v16 = vadd.f32 %v1258_v36, %v1180_v32  ;;  %v1507_v37 = vpop.f32.mrf.mxu1 }
 0x196   : > { %v1316_v40 = vadd.f32 %v1312_v34, %v1307_v35  ;;  %v1260_v41 = vpop.f32.mrf.mxu0 }
 0x197   : > { %v1314_v43 = vadd.f32 %v1312_v34, %v1305_v16  ;;  %v1306_v13 = vadd.f32 %v1260_v41, %v1181_v19  ;;  %v1302_v44 = vpop.f32.mrf.mxu1 }
 0x198   : > { %v1319_v45 = vand.u32 2147483647, %v1316_v40  ;;  %v1262_v47 = vpop.f32.mrf.mxu0 }
 0x199   : > { %v1317_v3 = vand.u32 2147483647, %v1314_v43  ;;  %v1315_v48 = vadd.f32 %v1312_v34, %v1306_v13  ;;  %v1508_v49 = vpop.f32.mrf.mxu1 }
 0x19a   : > { %v1263_v50 = vpop.f32.mrf.mxu0  ;;  %v1338_v52 = vsel %vm1335_vm13, %v1319_v45, 0.0 }
 0x19b   : > { %v1318_v51 = vand.u32 2147483647, %v1315_v48  ;;  %v1336_v53 = vsel %vm1333_vm14, %v1317_v3, 0.0  ;;  %v1341_v56 = vsel %vm1340_vm0, %v1338_v52, 0.0 }
 0x19d   : > { %v1337_v54 = vsel %vm1334_vm15, %v1318_v51, 0.0 }
 0x19e   : > { %v1339_v55 = vadd.f32 %v1337_v54, %v1336_v53 }
 0x1a0   : > { %v1342_v57 = vadd.f32 %v1341_v56, %v1339_v55 }
 0x1a2   : > { %1343 = vadd.xlane.f32.xlu1 %v1342_v57 }
 0x22b   : > { %v1344_v58 = vpop.xlane.xlu1 %1343 }
 0x22c   : > { %v1345_v59 = vrot.slane %v1344_v58, 4 }
 0x22e   : > { %v1346_v60 = vadd.f32 %v1345_v59, %v1344_v58 }
 0x230   : > { %v1347_v61 = vrot.slane %v1346_v60, 2 }
 0x232   : > { %v1348_v62 = vadd.f32 %v1347_v61, %v1346_v60 }
 0x234   : > { %v1349_v63 = vrot.slane %v1348_v62, 1 }
 0x236   : > { %v1350_v0 = vadd.f32 %v1349_v63, %v1348_v62 }
 0x238   : > { %1510 = vpush %v1350_v0 }
 0x269   : > { %s1511_s27 = spop %1510 }
 0x26a   : > { %s1352_s5 = smul.f32 0.00048828125, %s1511_s27 }
 0x26c   : > { %v1353_v1 = vstv %s1352_s5 }
 0x26d   : > { %1355 = vst.msk [vmem:[%s193_s30] sm:$0x1] %vm1354_vm1, %v1353_v1 }
 0x26e PF: > { %s14_s15 = sadd.s32 1, %s1546_s15  }
 0x26f   : > { %p11_p4 = scmp.ge.s32.totalorder %s14_s15, 4  }
 0x271   :  { %13 = sbr.rel (!%p11_p4) target bundleno = 1 (0x1), region = 74 }

</bundles_post_ra>
